<compile_context>
chip_gen: v6e
topology: v6e:2x2x1
jax: 0.10.0
libtpu: 0.0.40
codegen_flags: <defaults>
</compile_context>

<pallas_src>
import jax
import jax.numpy as jnp
from jax import lax
from jax.experimental import pallas as pl
from jax.experimental.pallas import tpu as pltpu

BLOCK_B = 128   # pairs per grid step (multiple of 128 -> lane-dense output row)
UNROLL = 8      # rows gathered per unrolled group (one vreg's worth of sublanes)


def mf_kernel(i_ref, j_ref, u_ref, v_ref, o_ref, u_tile, v_tile):
    # i_ref, j_ref  : SMEM int32 (B_pad,)      scalar-prefetched index vectors
    # u_ref, v_ref  : VMEM f32 (n_vertex, D)   full tables, resident for the whole call
    # o_ref         : VMEM f32 (1, BLOCK_B)    lane-dense output row for this block
    # u_tile, v_tile: VMEM f32 (BLOCK_B, D)    gather staging scratch
    blk = o_ref.shape[1]
    n_rows = u_ref.shape[0]
    base = pl.program_id(0) * blk

    def gather_group(t, carry):
        # 8 rows per group: dynamic base aligned to 8 sublanes, static offsets inside,
        # statically unrolled so the scheduler can interleave loads with stores.
        r0 = pl.multiple_of(t * UNROLL, UNROLL)
        for s in range(UNROLL):
            r = r0 + s
            iu = jnp.clip(i_ref[base + r], 0, n_rows - 1)   # clamp: no OOB VMEM reads
            iv = jnp.clip(j_ref[base + r], 0, n_rows - 1)
            u_tile[pl.ds(r, 1), :] = u_ref[pl.ds(iu, 1), :]
            v_tile[pl.ds(r, 1), :] = v_ref[pl.ds(iv, 1), :]
        return carry

    lax.fori_loop(0, blk // UNROLL, gather_group, 0)

    # One batched VPU multiply over the whole (blk, D) tile (vs. one per pair before).
    prod = u_tile[...] * v_tile[...]
    # Transpose (XLU slot, overlaps VPU) so the per-pair reduction runs over sublanes and
    # the result lands lane-major: a single unmasked (1, blk) store.  MXU intentionally
    # not used (gather/memory-bound op).
    o_ref[...] = jnp.sum(prod.T, axis=0, keepdims=True).astype(o_ref.dtype)


def _vmem_capacity_bytes():
    try:
        return int(pltpu.get_tpu_info().vmem_capacity_bytes)
    except Exception:
        return 64 * 1024 * 1024   # conservative: v7x per-TensorCore VMEM


def matrix_factorization(i_idx, j_idx, u_emb, v_emb, *, block_b=BLOCK_B):
    """Pallas equivalent of MatrixFactorization.forward(i, j) for 1-D index vectors."""
    assert block_b % 128 == 0 and block_b % UNROLL == 0
    n_vertex, out_dim = u_emb.shape
    B = i_idx.shape[0]

    num_blocks = pl.cdiv(B, block_b)
    b_pad = num_blocks * block_b

    i_p = jnp.pad(i_idx.astype(jnp.int32), (0, b_pad - B))   # pad with valid index 0
    j_p = jnp.pad(j_idx.astype(jnp.int32), (0, b_pad - B))
    u = u_emb.astype(jnp.float32)
    v = v_emb.astype(jnp.float32)

    # VMEM budget: tables (single resident copy) + two gather tiles + double-buffered out row.
    bytes_needed = (2 * n_vertex * out_dim * 4          # u_emb + v_emb
                    + 2 * block_b * out_dim * 4         # u_tile + v_tile scratch
                    + 2 * 2 * block_b * 4)              # double-buffered (1, block_b) out
    vmem_cap = _vmem_capacity_bytes()
    if bytes_needed + (8 << 20) > vmem_cap:
        # TODO(synk): for tables too large to stay VMEM-resident, switch u/v to
        # memory_space=pl.ANY and DMA-gather rows per block (double-buffered scratch).
        raise ValueError("embedding tables exceed the VMEM-resident fast path")
    vmem_limit = int(min(vmem_cap, max(bytes_needed + (8 << 20), 32 << 20)))

    out2d = pl.pallas_call(
        mf_kernel,
        out_shape=jax.ShapeDtypeStruct((1, b_pad), jnp.float32),
        grid_spec=pltpu.PrefetchScalarGridSpec(
            num_scalar_prefetch=2,                     # i_p, j_p -> SMEM before the grid
            grid=(num_blocks,),
            in_specs=[
                # Whole tables resident in VMEM, single copy (no pipelining / no 2x buffers).
                pl.BlockSpec(memory_space=pltpu.MemorySpace.VMEM),   # u_emb
                pl.BlockSpec(memory_space=pltpu.MemorySpace.VMEM),   # v_emb
            ],
            out_specs=pl.BlockSpec((1, block_b), lambda g, i_r, j_r: (0, g)),
            scratch_shapes=[
                pltpu.VMEM((block_b, out_dim), jnp.float32),
                pltpu.VMEM((block_b, out_dim), jnp.float32),
            ],
        ),
        compiler_params=pltpu.CompilerParams(
            dimension_semantics=("parallel",),   # shard B blocks across TCs on v7x
            vmem_limit_bytes=vmem_limit,         # raise v5e/v6e scoped default if needed
        ),
    )(i_p, j_p, u, v)

    return out2d[0, :B]


if __name__ == "__main__":
    # Small, module-consistent shapes: n_vertex=64 vocabulary, out_dim=128, batch B=8.
    n_vertex, out_dim, B = 64, 128, 8

    key = jax.random.PRNGKey(0)
    ku, kv, ki, kj = jax.random.split(key, 4)

    # torch.nn.Embedding default init is N(0, 1); reproduce deterministically.
    u_emb = jax.random.normal(ku, (n_vertex, out_dim), dtype=jnp.float32)
    v_emb = jax.random.normal(kv, (n_vertex, out_dim), dtype=jnp.float32)

    i_idx = jax.random.randint(ki, (B,), 0, n_vertex, dtype=jnp.int32)
    j_idx = jax.random.randint(kj, (B,), 0, n_vertex, dtype=jnp.int32)

    out = jax.jit(matrix_factorization)(i_idx, j_idx, u_emb, v_emb)
    out = jax.block_until_ready(out)

    # Pure-JAX reference of the PyTorch forward.
    ref = jnp.sum(u_emb[i_idx] * v_emb[j_idx], axis=-1)

    assert out.shape == (B,) and out.dtype == jnp.float32
    assert jnp.allclose(out, ref, atol=1e-4, rtol=1e-4)
    print("KERNEL_OK")
</pallas_src>

<mosaic_0001>
module attributes {stable_mosaic.version = 11 : i64} {
  func.func @mf_kernel(%arg0: i32, %arg1: memref<128xi32, #tpu.memory_space<smem>>, %arg2: memref<128xi32, #tpu.memory_space<smem>>, %arg3: memref<64x128xf32, #tpu.memory_space<vmem>>, %arg4: memref<64x128xf32, #tpu.memory_space<vmem>>, %arg5: memref<1x128xf32, #tpu.memory_space<vmem>>, %arg6: memref<128x128xf32, #tpu.memory_space<vmem>>, %arg7: memref<128x128xf32, #tpu.memory_space<vmem>>) attributes {dimension_semantics = [#tpu.dimension_semantics<parallel>], iteration_bounds = array<i64: 1>, scalar_prefetch = 2 : i64, scratch_operands = 2 : i64, tpu.core_type = #tpu.core_type<tc>, window_params = [{pipeline_mode = #tpu.pipeline_mode<synchronous>, transform_indices = @transform_0, window_bounds = array<i64: 64, 128>}, {pipeline_mode = #tpu.pipeline_mode<synchronous>, transform_indices = @transform_1, window_bounds = array<i64: 64, 128>}, {transform_indices = @transform_2, window_bounds = array<i64: 1, 128>}]} {
    %c128_i32 = arith.constant 128 : i32
    %0 = arith.muli %arg0, %c128_i32 : i32
    %c0_i32 = arith.constant 0 : i32
    %c16_i32 = arith.constant 16 : i32
    %1 = arith.addi %c0_i32, %c16_i32 : i32
    %c1_i32 = arith.constant 1 : i32
    scf.for %arg8 = %c0_i32 to %1 step %c1_i32  : i32 {
      %c8_i32 = arith.constant 8 : i32
      %9 = arith.muli %arg8, %c8_i32 : i32
      %10 = tpu.assume_multiple %9, 8 : i32
      %c0_i32_6 = arith.constant 0 : i32
      %11 = arith.addi %10, %c0_i32_6 : i32
      %12 = arith.addi %0, %11 : i32
      %13 = arith.index_cast %12 : i32 to index
      %14 = memref.load %arg1[%13] : memref<128xi32, #tpu.memory_space<smem>>
      %c0_i32_7 = arith.constant 0 : i32
      %c63_i32 = arith.constant 63 : i32
      %15 = arith.maxsi %c0_i32_7, %14 : i32
      %16 = arith.minsi %c63_i32, %15 : i32
      %17 = arith.addi %0, %11 : i32
      %18 = arith.index_cast %17 : i32 to index
      %19 = memref.load %arg2[%18] : memref<128xi32, #tpu.memory_space<smem>>
      %c0_i32_8 = arith.constant 0 : i32
      %c63_i32_9 = arith.constant 63 : i32
      %20 = arith.maxsi %c0_i32_8, %19 : i32
      %21 = arith.minsi %c63_i32_9, %20 : i32
      %22 = arith.index_cast %16 : i32 to index
      %c0_10 = arith.constant 0 : index
      %23 = vector.load %arg3[%22, %c0_10] : memref<64x128xf32, #tpu.memory_space<vmem>>, vector<1x128xf32>
      %24 = arith.index_cast %11 : i32 to index
      %c0_11 = arith.constant 0 : index
      %25 = vector.load %arg6[%24, %c0_11] : memref<128x128xf32, #tpu.memory_space<vmem>>, vector<1x128xf32>
      tpu.vector_store %arg6[%24, %c0_11], %23 {strides = array<i32>} : memref<128x128xf32, #tpu.memory_space<vmem>>, vector<1x128xf32>,
      %26 = arith.index_cast %21 : i32 to index
      %c0_12 = arith.constant 0 : index
      %27 = vector.load %arg4[%26, %c0_12] : memref<64x128xf32, #tpu.memory_space<vmem>>, vector<1x128xf32>
      %28 = arith.index_cast %11 : i32 to index
      %c0_13 = arith.constant 0 : index
      %29 = vector.load %arg7[%28, %c0_13] : memref<128x128xf32, #tpu.memory_space<vmem>>, vector<1x128xf32>
      tpu.vector_store %arg7[%28, %c0_13], %27 {strides = array<i32>} : memref<128x128xf32, #tpu.memory_space<vmem>>, vector<1x128xf32>,
      %c1_i32_14 = arith.constant 1 : i32
      %30 = arith.addi %10, %c1_i32_14 : i32
      %31 = arith.addi %0, %30 : i32
      %32 = arith.index_cast %31 : i32 to index
      %33 = memref.load %arg1[%32] : memref<128xi32, #tpu.memory_space<smem>>
      %c0_i32_15 = arith.constant 0 : i32
      %c63_i32_16 = arith.constant 63 : i32
      %34 = arith.maxsi %c0_i32_15, %33 : i32
      %35 = arith.minsi %c63_i32_16, %34 : i32
      %36 = arith.addi %0, %30 : i32
      %37 = arith.index_cast %36 : i32 to index
      %38 = memref.load %arg2[%37] : memref<128xi32, #tpu.memory_space<smem>>
      %c0_i32_17 = arith.constant 0 : i32
      %c63_i32_18 = arith.constant 63 : i32
      %39 = arith.maxsi %c0_i32_17, %38 : i32
      %40 = arith.minsi %c63_i32_18, %39 : i32
      %41 = arith.index_cast %35 : i32 to index
      %c0_19 = arith.constant 0 : index
      %42 = vector.load %arg3[%41, %c0_19] : memref<64x128xf32, #tpu.memory_space<vmem>>, vector<1x128xf32>
      %43 = arith.index_cast %30 : i32 to index
      %c0_20 = arith.constant 0 : index
      %44 = vector.load %arg6[%43, %c0_20] : memref<128x128xf32, #tpu.memory_space<vmem>>, vector<1x128xf32>
      tpu.vector_store %arg6[%43, %c0_20], %42 {strides = array<i32>} : memref<128x128xf32, #tpu.memory_space<vmem>>, vector<1x128xf32>,
      %45 = arith.index_cast %40 : i32 to index
      %c0_21 = arith.constant 0 : index
      %46 = vector.load %arg4[%45, %c0_21] : memref<64x128xf32, #tpu.memory_space<vmem>>, vector<1x128xf32>
      %47 = arith.index_cast %30 : i32 to index
      %c0_22 = arith.constant 0 : index
      %48 = vector.load %arg7[%47, %c0_22] : memref<128x128xf32, #tpu.memory_space<vmem>>, vector<1x128xf32>
      tpu.vector_store %arg7[%47, %c0_22], %46 {strides = array<i32>} : memref<128x128xf32, #tpu.memory_space<vmem>>, vector<1x128xf32>,
      %c2_i32 = arith.constant 2 : i32
      %49 = arith.addi %10, %c2_i32 : i32
      %50 = arith.addi %0, %49 : i32
      %51 = arith.index_cast %50 : i32 to index
      %52 = memref.load %arg1[%51] : memref<128xi32, #tpu.memory_space<smem>>
      %c0_i32_23 = arith.constant 0 : i32
      %c63_i32_24 = arith.constant 63 : i32
      %53 = arith.maxsi %c0_i32_23, %52 : i32
      %54 = arith.minsi %c63_i32_24, %53 : i32
      %55 = arith.addi %0, %49 : i32
      %56 = arith.index_cast %55 : i32 to index
      %57 = memref.load %arg2[%56] : memref<128xi32, #tpu.memory_space<smem>>
      %c0_i32_25 = arith.constant 0 : i32
      %c63_i32_26 = arith.constant 63 : i32
      %58 = arith.maxsi %c0_i32_25, %57 : i32
      %59 = arith.minsi %c63_i32_26, %58 : i32
      %60 = arith.index_cast %54 : i32 to index
      %c0_27 = arith.constant 0 : index
      %61 = vector.load %arg3[%60, %c0_27] : memref<64x128xf32, #tpu.memory_space<vmem>>, vector<1x128xf32>
      %62 = arith.index_cast %49 : i32 to index
      %c0_28 = arith.constant 0 : index
      %63 = vector.load %arg6[%62, %c0_28] : memref<128x128xf32, #tpu.memory_space<vmem>>, vector<1x128xf32>
      tpu.vector_store %arg6[%62, %c0_28], %61 {strides = array<i32>} : memref<128x128xf32, #tpu.memory_space<vmem>>, vector<1x128xf32>,
      %64 = arith.index_cast %59 : i32 to index
      %c0_29 = arith.constant 0 : index
      %65 = vector.load %arg4[%64, %c0_29] : memref<64x128xf32, #tpu.memory_space<vmem>>, vector<1x128xf32>
      %66 = arith.index_cast %49 : i32 to index
      %c0_30 = arith.constant 0 : index
      %67 = vector.load %arg7[%66, %c0_30] : memref<128x128xf32, #tpu.memory_space<vmem>>, vector<1x128xf32>
      tpu.vector_store %arg7[%66, %c0_30], %65 {strides = array<i32>} : memref<128x128xf32, #tpu.memory_space<vmem>>, vector<1x128xf32>,
      %c3_i32 = arith.constant 3 : i32
      %68 = arith.addi %10, %c3_i32 : i32
      %69 = arith.addi %0, %68 : i32
      %70 = arith.index_cast %69 : i32 to index
      %71 = memref.load %arg1[%70] : memref<128xi32, #tpu.memory_space<smem>>
      %c0_i32_31 = arith.constant 0 : i32
      %c63_i32_32 = arith.constant 63 : i32
      %72 = arith.maxsi %c0_i32_31, %71 : i32
      %73 = arith.minsi %c63_i32_32, %72 : i32
      %74 = arith.addi %0, %68 : i32
      %75 = arith.index_cast %74 : i32 to index
      %76 = memref.load %arg2[%75] : memref<128xi32, #tpu.memory_space<smem>>
      %c0_i32_33 = arith.constant 0 : i32
      %c63_i32_34 = arith.constant 63 : i32
      %77 = arith.maxsi %c0_i32_33, %76 : i32
      %78 = arith.minsi %c63_i32_34, %77 : i32
      %79 = arith.index_cast %73 : i32 to index
      %c0_35 = arith.constant 0 : index
      %80 = vector.load %arg3[%79, %c0_35] : memref<64x128xf32, #tpu.memory_space<vmem>>, vector<1x128xf32>
      %81 = arith.index_cast %68 : i32 to index
      %c0_36 = arith.constant 0 : index
      %82 = vector.load %arg6[%81, %c0_36] : memref<128x128xf32, #tpu.memory_space<vmem>>, vector<1x128xf32>
      tpu.vector_store %arg6[%81, %c0_36], %80 {strides = array<i32>} : memref<128x128xf32, #tpu.memory_space<vmem>>, vector<1x128xf32>,
      %83 = arith.index_cast %78 : i32 to index
      %c0_37 = arith.constant 0 : index
      %84 = vector.load %arg4[%83, %c0_37] : memref<64x128xf32, #tpu.memory_space<vmem>>, vector<1x128xf32>
      %85 = arith.index_cast %68 : i32 to index
      %c0_38 = arith.constant 0 : index
      %86 = vector.load %arg7[%85, %c0_38] : memref<128x128xf32, #tpu.memory_space<vmem>>, vector<1x128xf32>
      tpu.vector_store %arg7[%85, %c0_38], %84 {strides = array<i32>} : memref<128x128xf32, #tpu.memory_space<vmem>>, vector<1x128xf32>,
      %c4_i32 = arith.constant 4 : i32
      %87 = arith.addi %10, %c4_i32 : i32
      %88 = arith.addi %0, %87 : i32
      %89 = arith.index_cast %88 : i32 to index
      %90 = memref.load %arg1[%89] : memref<128xi32, #tpu.memory_space<smem>>
      %c0_i32_39 = arith.constant 0 : i32
      %c63_i32_40 = arith.constant 63 : i32
      %91 = arith.maxsi %c0_i32_39, %90 : i32
      %92 = arith.minsi %c63_i32_40, %91 : i32
      %93 = arith.addi %0, %87 : i32
      %94 = arith.index_cast %93 : i32 to index
      %95 = memref.load %arg2[%94] : memref<128xi32, #tpu.memory_space<smem>>
      %c0_i32_41 = arith.constant 0 : i32
      %c63_i32_42 = arith.constant 63 : i32
      %96 = arith.maxsi %c0_i32_41, %95 : i32
      %97 = arith.minsi %c63_i32_42, %96 : i32
      %98 = arith.index_cast %92 : i32 to index
      %c0_43 = arith.constant 0 : index
      %99 = vector.load %arg3[%98, %c0_43] : memref<64x128xf32, #tpu.memory_space<vmem>>, vector<1x128xf32>
      %100 = arith.index_cast %87 : i32 to index
      %c0_44 = arith.constant 0 : index
      %101 = vector.load %arg6[%100, %c0_44] : memref<128x128xf32, #tpu.memory_space<vmem>>, vector<1x128xf32>
      tpu.vector_store %arg6[%100, %c0_44], %99 {strides = array<i32>} : memref<128x128xf32, #tpu.memory_space<vmem>>, vector<1x128xf32>,
      %102 = arith.index_cast %97 : i32 to index
      %c0_45 = arith.constant 0 : index
      %103 = vector.load %arg4[%102, %c0_45] : memref<64x128xf32, #tpu.memory_space<vmem>>, vector<1x128xf32>
      %104 = arith.index_cast %87 : i32 to index
      %c0_46 = arith.constant 0 : index
      %105 = vector.load %arg7[%104, %c0_46] : memref<128x128xf32, #tpu.memory_space<vmem>>, vector<1x128xf32>
      tpu.vector_store %arg7[%104, %c0_46], %103 {strides = array<i32>} : memref<128x128xf32, #tpu.memory_space<vmem>>, vector<1x128xf32>,
      %c5_i32 = arith.constant 5 : i32
      %106 = arith.addi %10, %c5_i32 : i32
      %107 = arith.addi %0, %106 : i32
      %108 = arith.index_cast %107 : i32 to index
      %109 = memref.load %arg1[%108] : memref<128xi32, #tpu.memory_space<smem>>
      %c0_i32_47 = arith.constant 0 : i32
      %c63_i32_48 = arith.constant 63 : i32
      %110 = arith.maxsi %c0_i32_47, %109 : i32
      %111 = arith.minsi %c63_i32_48, %110 : i32
      %112 = arith.addi %0, %106 : i32
      %113 = arith.index_cast %112 : i32 to index
      %114 = memref.load %arg2[%113] : memref<128xi32, #tpu.memory_space<smem>>
      %c0_i32_49 = arith.constant 0 : i32
      %c63_i32_50 = arith.constant 63 : i32
      %115 = arith.maxsi %c0_i32_49, %114 : i32
      %116 = arith.minsi %c63_i32_50, %115 : i32
      %117 = arith.index_cast %111 : i32 to index
      %c0_51 = arith.constant 0 : index
      %118 = vector.load %arg3[%117, %c0_51] : memref<64x128xf32, #tpu.memory_space<vmem>>, vector<1x128xf32>
      %119 = arith.index_cast %106 : i32 to index
      %c0_52 = arith.constant 0 : index
      %120 = vector.load %arg6[%119, %c0_52] : memref<128x128xf32, #tpu.memory_space<vmem>>, vector<1x128xf32>
      tpu.vector_store %arg6[%119, %c0_52], %118 {strides = array<i32>} : memref<128x128xf32, #tpu.memory_space<vmem>>, vector<1x128xf32>,
      %121 = arith.index_cast %116 : i32 to index
      %c0_53 = arith.constant 0 : index
      %122 = vector.load %arg4[%121, %c0_53] : memref<64x128xf32, #tpu.memory_space<vmem>>, vector<1x128xf32>
      %123 = arith.index_cast %106 : i32 to index
      %c0_54 = arith.constant 0 : index
      %124 = vector.load %arg7[%123, %c0_54] : memref<128x128xf32, #tpu.memory_space<vmem>>, vector<1x128xf32>
      tpu.vector_store %arg7[%123, %c0_54], %122 {strides = array<i32>} : memref<128x128xf32, #tpu.memory_space<vmem>>, vector<1x128xf32>,
      %c6_i32 = arith.constant 6 : i32
      %125 = arith.addi %10, %c6_i32 : i32
      %126 = arith.addi %0, %125 : i32
      %127 = arith.index_cast %126 : i32 to index
      %128 = memref.load %arg1[%127] : memref<128xi32, #tpu.memory_space<smem>>
      %c0_i32_55 = arith.constant 0 : i32
      %c63_i32_56 = arith.constant 63 : i32
      %129 = arith.maxsi %c0_i32_55, %128 : i32
      %130 = arith.minsi %c63_i32_56, %129 : i32
      %131 = arith.addi %0, %125 : i32
      %132 = arith.index_cast %131 : i32 to index
      %133 = memref.load %arg2[%132] : memref<128xi32, #tpu.memory_space<smem>>
      %c0_i32_57 = arith.constant 0 : i32
      %c63_i32_58 = arith.constant 63 : i32
      %134 = arith.maxsi %c0_i32_57, %133 : i32
      %135 = arith.minsi %c63_i32_58, %134 : i32
      %136 = arith.index_cast %130 : i32 to index
      %c0_59 = arith.constant 0 : index
      %137 = vector.load %arg3[%136, %c0_59] : memref<64x128xf32, #tpu.memory_space<vmem>>, vector<1x128xf32>
      %138 = arith.index_cast %125 : i32 to index
      %c0_60 = arith.constant 0 : index
      %139 = vector.load %arg6[%138, %c0_60] : memref<128x128xf32, #tpu.memory_space<vmem>>, vector<1x128xf32>
      tpu.vector_store %arg6[%138, %c0_60], %137 {strides = array<i32>} : memref<128x128xf32, #tpu.memory_space<vmem>>, vector<1x128xf32>,
      %140 = arith.index_cast %135 : i32 to index
      %c0_61 = arith.constant 0 : index
      %141 = vector.load %arg4[%140, %c0_61] : memref<64x128xf32, #tpu.memory_space<vmem>>, vector<1x128xf32>
      %142 = arith.index_cast %125 : i32 to index
      %c0_62 = arith.constant 0 : index
      %143 = vector.load %arg7[%142, %c0_62] : memref<128x128xf32, #tpu.memory_space<vmem>>, vector<1x128xf32>
      tpu.vector_store %arg7[%142, %c0_62], %141 {strides = array<i32>} : memref<128x128xf32, #tpu.memory_space<vmem>>, vector<1x128xf32>,
      %c7_i32 = arith.constant 7 : i32
      %144 = arith.addi %10, %c7_i32 : i32
      %145 = arith.addi %0, %144 : i32
      %146 = arith.index_cast %145 : i32 to index
      %147 = memref.load %arg1[%146] : memref<128xi32, #tpu.memory_space<smem>>
      %c0_i32_63 = arith.constant 0 : i32
      %c63_i32_64 = arith.constant 63 : i32
      %148 = arith.maxsi %c0_i32_63, %147 : i32
      %149 = arith.minsi %c63_i32_64, %148 : i32
      %150 = arith.addi %0, %144 : i32
      %151 = arith.index_cast %150 : i32 to index
      %152 = memref.load %arg2[%151] : memref<128xi32, #tpu.memory_space<smem>>
      %c0_i32_65 = arith.constant 0 : i32
      %c63_i32_66 = arith.constant 63 : i32
      %153 = arith.maxsi %c0_i32_65, %152 : i32
      %154 = arith.minsi %c63_i32_66, %153 : i32
      %155 = arith.index_cast %149 : i32 to index
      %c0_67 = arith.constant 0 : index
      %156 = vector.load %arg3[%155, %c0_67] : memref<64x128xf32, #tpu.memory_space<vmem>>, vector<1x128xf32>
      %157 = arith.index_cast %144 : i32 to index
      %c0_68 = arith.constant 0 : index
      %158 = vector.load %arg6[%157, %c0_68] : memref<128x128xf32, #tpu.memory_space<vmem>>, vector<1x128xf32>
      tpu.vector_store %arg6[%157, %c0_68], %156 {strides = array<i32>} : memref<128x128xf32, #tpu.memory_space<vmem>>, vector<1x128xf32>,
      %159 = arith.index_cast %154 : i32 to index
      %c0_69 = arith.constant 0 : index
      %160 = vector.load %arg4[%159, %c0_69] : memref<64x128xf32, #tpu.memory_space<vmem>>, vector<1x128xf32>
      %161 = arith.index_cast %144 : i32 to index
      %c0_70 = arith.constant 0 : index
      %162 = vector.load %arg7[%161, %c0_70] : memref<128x128xf32, #tpu.memory_space<vmem>>, vector<1x128xf32>
      tpu.vector_store %arg7[%161, %c0_70], %160 {strides = array<i32>} : memref<128x128xf32, #tpu.memory_space<vmem>>, vector<1x128xf32>,
    }
    %c16_i32_0 = arith.constant 16 : i32
    %c0 = arith.constant 0 : index
    %c0_1 = arith.constant 0 : index
    %2 = vector.load %arg6[%c0, %c0_1] : memref<128x128xf32, #tpu.memory_space<vmem>>, vector<128x128xf32>
    %c0_2 = arith.constant 0 : index
    %c0_3 = arith.constant 0 : index
    %3 = vector.load %arg7[%c0_2, %c0_3] : memref<128x128xf32, #tpu.memory_space<vmem>>, vector<128x128xf32>
    %4 = arith.mulf %2, %3 : vector<128x128xf32>
    %5 = tpu.transpose %4, [1, 0] : vector<128x128xf32> -> vector<128x128xf32>
    %cst = arith.constant dense<0.000000e+00> : vector<128xf32>
    %6 = vector.multi_reduction <add>, %5, %cst [0] : vector<128x128xf32> to vector<128xf32>
    %7 = vector.shape_cast %6 : vector<128xf32> to vector<1x128xf32>
    %c0_4 = arith.constant 0 : index
    %c0_5 = arith.constant 0 : index
    %8 = vector.load %arg5[%c0_4, %c0_5] : memref<1x128xf32, #tpu.memory_space<vmem>>, vector<1x128xf32>
    tpu.vector_store %arg5[%c0_4, %c0_5], %7 {strides = array<i32>} : memref<1x128xf32, #tpu.memory_space<vmem>>, vector<1x128xf32>,
    return
  }
  func.func @transform_0(%arg0: i32, %arg1: memref<128xi32, #tpu.memory_space<smem>>, %arg2: memref<128xi32, #tpu.memory_space<smem>>) -> (i32, i32) {
    %c0_i32 = arith.constant 0 : i32
    %c0_i32_0 = arith.constant 0 : i32
    %c0_i32_1 = arith.constant 0 : i32
    return %c0_i32, %c0_i32_0 : i32, i32
  }
  func.func @transform_1(%arg0: i32, %arg1: memref<128xi32, #tpu.memory_space<smem>>, %arg2: memref<128xi32, #tpu.memory_space<smem>>) -> (i32, i32) {
    %c0_i32 = arith.constant 0 : i32
    %c0_i32_0 = arith.constant 0 : i32
    %c0_i32_1 = arith.constant 0 : i32
    return %c0_i32, %c0_i32_0 : i32, i32
  }
  func.func @transform_2(%arg0: i32, %arg1: memref<128xi32, #tpu.memory_space<smem>>, %arg2: memref<128xi32, #tpu.memory_space<smem>>) -> (i32, i32) {
    %c0_i32 = arith.constant 0 : i32
    %c0_i32_0 = arith.constant 0 : i32
    return %c0_i32, %arg0 : i32, i32
  }
}

</mosaic_0001>

<bundles_post_ra>
// kernel: matrix_factorization.1
= control target key start
LH: loop header
LB: loop body
LE: loop exit
PB: predicated region body
PF: predicated region fallthrough
CT: control target
= control target key end

     0   :  { %s760_s0 = inlined_call_operand.vmem [shape: s32[128], index: 0, kind: input, shape index: {}]   ;;  %s761_s2 = inlined_call_operand.hbm [shape: f32[64,128], index: 2, kind: input, shape index: {}]   ;;  %s762_s3 = inlined_call_operand.hbm [shape: f32[64,128], index: 3, kind: input, shape index: {}]   ;;  %s763_s4 = inlined_call_operand.vmem [shape: f32[1,128], index: 4, kind: output, shape index: {}]   ;;  %s764_s1 = inlined_call_operand.vmem [shape: s32[128], index: 1, kind: input, shape index: {}]  }
   0x1   :  { %s9_s17 = sshll.u32 %s760_s0, 4  ;;  %s13_s20 = sshll.u32 %s764_s1, 4  ;;  %s10_s17 = int_to_ptr.vmem [resolvable:$true] %s9_s17  ;;  %s14_s20 = int_to_ptr.vmem [resolvable:$true] %s13_s20 }
   0x2   :  { %s548_s21 = scalar_lea.vmem %s10_s17, 16  ;;  %p553_p1 = scmp.lt.s32.totalorder %s10_s17, %s10_s17 }
   0x3   :  { %p549_p0 = scmp.ne.s32.totalorder %s10_s17, %s548_s21  ;;  %p554_p2 = scmp.lt.s32.totalorder %s548_s21, %s548_s21 }
   0x5   :  { %p555_p3 = por %p554_p2, %p553_p1 }
   0x7   :  { %p556_p4 = pnand %p555_p3, %p549_p0 }
   0x9   :  { %559 = shalt.err (!%p556_p4)  }
   0xa   :  { %s626_s22 = smov [#allocation5]   ;;  %s560_s23 = scalar_lea.vmem %s14_s20, 16 }
   0xb   :  { %12 = dma.vmem_to_smem %s10_s17, 16, %s626_s22, [#allocation4] }
   0xc   :  { %p561_p5 = scmp.ne.s32.totalorder %s14_s20, %s560_s23  ;;  %p565_p6 = scmp.lt.s32.totalorder %s14_s20, %s14_s20 }
   0xd   :  { %p566_p7 = scmp.lt.s32.totalorder %s560_s23, %s560_s23 }
   0xf   :  { %p567_p8 = por %p566_p7, %p565_p6 }
  0x11   :  { %p568_p9 = pnand %p567_p8, %p561_p5 }
  0x13   :  { %571 = shalt.err (!%p568_p9)  }
  0x14   :  { %s627_s0 = smov [#allocation6]  }
  0x15   :  { %16 = dma.vmem_to_smem %s14_s20, 16, %s627_s0, [#allocation4] }
  0x16   :  { %616 = dma.done.wait [#allocation4], 32 }
  0x17   :  { %617 = vsyncadd [#allocation4], 4294967264 }
  0x18   :  { %18 = sfence }
  0x19   :  { %19 = vsyncpa [#allocation8], 0 }
  0x1a   :  { %20 = vsyncpa [#allocation10], 0  ;;  %s628_s1 = smov [#allocation7]  }
  0x1b   :  { %s26_s24 = sshll.u32 %s628_s1, 4  ;;  %s27_s24 = int_to_ptr.vmem [resolvable:$true] %s26_s24 }
  0x1c   :  { %s580_s25 = scalar_lea.vmem %s27_s24, 1024  ;;  %p585_p11 = scmp.lt.s32.totalorder %s27_s24, %s27_s24 }
  0x1d   :  { %p581_p10 = scmp.ne.s32.totalorder %s27_s24, %s580_s25  ;;  %p586_p12 = scmp.lt.s32.totalorder %s580_s25, %s580_s25 }
  0x1f   :  { %p587_p13 = por %p586_p12, %p585_p11 }
  0x21   :  { %p588_p0 = pnand %p587_p13, %p581_p10 }
  0x23   :  { %591 = shalt.err (!%p588_p0)
}
  0x24   :  { %s629_s26 = smov 128   ;;  %s630_s27 = smov 8  }
  0x25   :  { %32 = dma.hbm_to_vmem [thread:$0]  %s761_s2, 1024, %s27_s24, [#allocation8], %s629_s26, %s629_s26, %s630_s27  }
  0x26   :  { %s631_s30 = smov [#allocation9]  }
  0x27   :  { %s38_s5 = sshll.u32 %s631_s30, 4  ;;  %s39_s5 = int_to_ptr.vmem [resolvable:$true] %s38_s5 }
  0x28   :  { %s600_s6 = scalar_lea.vmem %s39_s5, 1024  ;;  %p605_p2 = scmp.lt.s32.totalorder %s39_s5, %s39_s5 }
  0x29   :  { %p601_p1 = scmp.ne.s32.totalorder %s39_s5, %s600_s6  ;;  %p606_p3 = scmp.lt.s32.totalorder %s600_s6, %s600_s6 }
  0x2b   :  { %p607_p4 = por %p606_p3, %p605_p2 }
  0x2d   :  { %p608_p5 = pnand %p607_p4, %p601_p1 }
  0x2f   :  { %611 = shalt.err (!%p608_p5)
}
  0x30   :  { %44 = dma.hbm_to_vmem [thread:$0]  %s762_s3, 1024, %s39_s5, [#allocation10], %s629_s26, %s629_s26, %s630_s27  }
  0x31   :  { %618 = dma.done.wait [#allocation8], 1024  }
  0x32   :  { %619 = vsyncadd [#allocation8], 4294966272 }
  0x33   :  { %620 = dma.done.wait [#allocation10], 1024  }
  0x34   :  { %621 = vsyncadd [#allocation10], 4294966272  ;;  %s669_s9 = smov 0  }
  0x35 LB: > { %s675_s2 = sshll.u32 %s624_s9, 3  ;;  %s57_s9 = sadd.s32 1, %s624_s9   ;;  %s624_s9 = sphi %s669_s9, %s57_s9  }
  0x36   : > { %s60_s3 = sld [smem:[#allocation5 + %s675_s2]]  ;;  %s78_s11 = sadd.s32 1, %s675_s2 }
  0x37   : > { %s65_s10 = sld [smem:[#allocation6 + %s675_s2]]  ;;  %s98_s12 = sadd.s32 2, %s675_s2 }
  0x38   : > { %s80_s13 = sld [smem:[#allocation5 + %s78_s11]]  ;;  %s118_s16 = sadd.s32 3, %s675_s2 }
  0x39   : > { %s681_s14 = sld [smem:[#allocation6 + %s78_s11]]  ;;  %s689_s18 = scalar_lea.vmem [#allocation2], %s675_s2 }
  0x3a   : > { %s685_s15 = sld [smem:[#allocation5 + %s98_s12]]  ;;  %s693_s20 = scalar_lea.vmem [#allocation3], %s675_s2 }
  0x3b   : > { %s105_s0 = sld [smem:[#allocation6 + %s98_s12]]  ;;  %s138_s1 = sadd.s32 4, %s675_s2 }
  0x3c   : > { %p61_p6 = scmp.gt.s32.totalorder %s60_s3, 0  ;;  %p394_p7 = scmp.lt.s32.totalorder %s60_s3, 63 }
  0x3d   : > { %p66_p8 = scmp.gt.s32.totalorder %s65_s10, 0  ;;  %p399_p9 = scmp.lt.s32.totalorder %s65_s10, 63 }
  0x3e   : > { %s766_s3 = smov (!%p61_p6, %s60_s3), 0  ;;  %p81_p10 = scmp.gt.s32.totalorder %s80_s13, 0 }
  0x3f   : > { %s768_s10 = smov (!%p66_p8, %s65_s10), 0  ;;  %s770_s3 = smov (!%p394_p7, %s766_s3), 63 }
  0x40   : > { %s772_s10 = smov (!%p399_p9, %s768_s10), 63  ;;  %s70_s17 = scalar_lea.vmem [#allocation7], %s770_s3 }
  0x41   : > { %v71_v0 = vld [vmem:[%s70_s17] sm:$0x1]  ;;  %p404_p11 = scmp.lt.s32.totalorder %s80_s13, 63  ;;  %s74_s19 = scalar_lea.vmem [#allocation9], %s772_s10 }
  0x42   : > { %73 = vst [vmem:[%s689_s18] sm:$0x1] %v71_v0  ;;  %v75_v1 = vld [vmem:[%s74_s19] sm:$0x1]  ;;  %s774_s13 = smov (!%p81_p10, %s80_s13), 0  ;;  %p86_p12 = scmp.gt.s32.totalorder %s681_s14, 0 }
  0x43   : > { %77 = vst [vmem:[%s693_s20] sm:$0x1] %v75_v1  ;;  %p409_p13 = scmp.lt.s32.totalorder %s681_s14, 63  ;;  %s776_s13 = smov (!%p404_p11, %s774_s13), 63 }
  0x44   : > { %s778_s14 = smov (!%p86_p12, %s681_s14), 0  ;;  %p101_p0 = scmp.gt.s32.totalorder %s685_s15, 0 }
  0x45   : > { %s90_s21 = scalar_lea.vmem [#allocation7], %s776_s13  ;;  %s780_s14 = smov (!%p409_p13, %s778_s14), 63 }
  0x46   : > { %v91_v2 = vld [vmem:[%s90_s21] sm:$0x1]  ;;  %s102_s22 = scalar_select %p101_p0, %s685_s15, 0 }
  0x47   : > { %415 = vst [vmem:[%s689_s18 + $0x1] sm:$0x1] %v91_v2  ;;  %p418_p1 = scmp.lt.s32.totalorder %s685_s15, 63  ;;  %s94_s23 = scalar_lea.vmem [#allocation9], %s780_s14 }
  0x48   : > { %v95_v3 = vld [vmem:[%s94_s23] sm:$0x1]  ;;  %s120_s24 = sld [smem:[#allocation5 + %s118_s16]]  ;;  %s158_s28 = sadd.s32 5, %s675_s2 }
  0x49   : > { %417 = vst [vmem:[%s693_s20 + $0x1] sm:$0x1] %v95_v3  ;;  %s782_s22 = smov (!%p418_p1, %s102_s22), 63  ;;  %s125_s25 = sld [smem:[#allocation6 + %s118_s16]] }
  0x4a   : > { %s110_s26 = scalar_lea.vmem [#allocation7], %s782_s22  ;;  %s711_s27 = sld [smem:[#allocation5 + %s138_s1]] }
  0x4b   : > { %v111_v4 = vld [vmem:[%s110_s26] sm:$0x1]  ;;  %s715_s29 = sld [smem:[#allocation6 + %s138_s1]]  ;;  %p106_p2 = scmp.gt.s32.totalorder %s105_s0, 0 }
  0x4c   : > { %429 = vst [vmem:[%s689_s18 + $0x2] sm:$0x1] %v111_v4  ;;  %p423_p3 = scmp.lt.s32.totalorder %s105_s0, 63  ;;  %s719_s30 = sld [smem:[#allocation5 + %s158_s28]] }
  0x4d   : > { %s178_s5 = sadd.s32 6, %s675_s2  ;;  %s784_s0 = smov (!%p106_p2, %s105_s0), 0 }
  0x4e   : > { %p121_p4 = scmp.gt.s32.totalorder %s120_s24, 0  ;;  %p432_p5 = scmp.lt.s32.totalorder %s120_s24, 63 }
  0x4f   : > { %s786_s0 = smov (!%p423_p3, %s784_s0), 63  ;;  %p126_p6 = scmp.gt.s32.totalorder %s125_s25, 0 }
  0x50   : > { %s788_s24 = smov (!%p121_p4, %s120_s24), 0  ;;  %s114_s6 = scalar_lea.vmem [#allocation9], %s786_s0 }
  0x51   : > { %v115_v5 = vld [vmem:[%s114_s6] sm:$0x1]  ;;  %s790_s24 = smov (!%p432_p5, %s788_s24), 63  ;;  %p437_p7 = scmp.lt.s32.totalorder %s125_s25, 63 }
  0x52   : > { %431 = vst [vmem:[%s693_s20 + $0x2] sm:$0x1] %v115_v5  ;;  %s127_s7 = scalar_select %p126_p6, %s125_s25, 0 }
  0x53   : > { %s130_s8 = scalar_lea.vmem [#allocation7], %s790_s24  ;;  %p141_p8 = scmp.gt.s32.totalorder %s711_s27, 0 }
  0x54   : > { %v131_v6 = vld [vmem:[%s130_s8] sm:$0x1]  ;;  %p446_p9 = scmp.lt.s32.totalorder %s711_s27, 63  ;;  %s792_s7 = smov (!%p437_p7, %s127_s7), 63 }
  0x55   : > { %443 = vst [vmem:[%s689_s18 + $0x3] sm:$0x1] %v131_v6  ;;  %s794_s27 = smov (!%p141_p8, %s711_s27), 0  ;;  %p146_p10 = scmp.gt.s32.totalorder %s715_s29, 0 }
  0x56   : > { %s134_s3 = scalar_lea.vmem [#allocation9], %s792_s7  ;;  %s796_s27 = smov (!%p446_p9, %s794_s27), 63 }
  0x57   : > { %v135_v7 = vld [vmem:[%s134_s3] sm:$0x1]  ;;  %s147_s10 = scalar_select %p146_p10, %s715_s29, 0 }
  0x58   : > { %445 = vst [vmem:[%s693_s20 + $0x3] sm:$0x1] %v135_v7  ;;  %p451_p11 = scmp.lt.s32.totalorder %s715_s29, 63  ;;  %s150_s11 = scalar_lea.vmem [#allocation7], %s796_s27 }
  0x59   : > { %v151_v8 = vld [vmem:[%s150_s11] sm:$0x1]  ;;  %p161_p12 = scmp.gt.s32.totalorder %s719_s30, 0  ;;  %p460_p13 = scmp.lt.s32.totalorder %s719_s30, 63 }
  0x5a   : > { %457 = vst [vmem:[%s689_s18 + $0x4] sm:$0x1] %v151_v8  ;;  %s798_s10 = smov (!%p451_p11, %s147_s10), 63  ;;  %s165_s12 = sld [smem:[#allocation6 + %s158_s28]] }
  0x5b   : > { %s800_s30 = smov (!%p161_p12, %s719_s30), 0  ;;  %s154_s13 = scalar_lea.vmem [#allocation9], %s798_s10 }
  0x5c   : > { %v155_v9 = vld [vmem:[%s154_s13] sm:$0x1]  ;;  %s802_s30 = smov (!%p460_p13, %s800_s30), 63  ;;  %s180_s14 = sld [smem:[#allocation5 + %s178_s5]] }
  0x5d   : > { %459 = vst [vmem:[%s693_s20 + $0x4] sm:$0x1] %v155_v9  ;;  %s198_s15 = sadd.s32 7, %s675_s2  ;;  %s170_s16 = scalar_lea.vmem [#allocation7], %s802_s30 }
  0x5e   : > { %v171_v10 = vld [vmem:[%s170_s16] sm:$0x1]  ;;  %s185_s17 = sld [smem:[#allocation6 + %s178_s5]]  ;;  %p54_p10 = scmp.ge.s32.totalorder %s57_s9, 16  }
  0x5f   : > { %471 = vst [vmem:[%s689_s18 + $0x5] sm:$0x1] %v171_v10  ;;  %s200_s19 = sld [smem:[#allocation5 + %s198_s15]] }
  0x60   : > { %p166_p0 = scmp.gt.s32.totalorder %s165_s12, 0  ;;  %p465_p1 = scmp.lt.s32.totalorder %s165_s12, 63 }
  0x61   : > { %s744_s21 = sld [smem:[#allocation6 + %s198_s15]] }
  0x62   : > { %s804_s12 = smov (!%p166_p0, %s165_s12), 0  ;;  %p181_p2 = scmp.gt.s32.totalorder %s180_s14, 0 }
  0x63   : > { %p474_p3 = scmp.lt.s32.totalorder %s180_s14, 63  ;;  %s806_s12 = smov (!%p465_p1, %s804_s12), 63 }
  0x64   : > { %s808_s14 = smov (!%p181_p2, %s180_s14), 0  ;;  %p186_p4 = scmp.gt.s32.totalorder %s185_s17, 0 }
  0x65   : > { %s174_s22 = scalar_lea.vmem [#allocation9], %s806_s12  ;;  %s810_s14 = smov (!%p474_p3, %s808_s14), 63 }
  0x66   : > { %v175_v11 = vld [vmem:[%s174_s22] sm:$0x1]  ;;  %s187_s2 = scalar_select %p186_p4, %s185_s17, 0 }
  0x67   : > { %473 = vst [vmem:[%s693_s20 + $0x5] sm:$0x1] %v175_v11  ;;  %p479_p5 = scmp.lt.s32.totalorder %s185_s17, 63  ;;  %s190_s23 = scalar_lea.vmem [#allocation7], %s810_s14 }
  0x68   : > { %v191_v12 = vld [vmem:[%s190_s23] sm:$0x1]  ;;  %p201_p6 = scmp.gt.s32.totalorder %s200_s19, 0  ;;  %p488_p7 = scmp.lt.s32.totalorder %s200_s19, 63 }
  0x69   : > { %485 = vst [vmem:[%s689_s18 + $0x6] sm:$0x1] %v191_v12  ;;  %s812_s2 = smov (!%p479_p5, %s187_s2), 63  ;;  %p206_p8 = scmp.gt.s32.totalorder %s744_s21, 0 }
  0x6a   : > { %s814_s19 = smov (!%p201_p6, %s200_s19), 0  ;;  %s194_s0 = scalar_lea.vmem [#allocation9], %s812_s2 }
  0x6b   : > { %v195_v13 = vld [vmem:[%s194_s0] sm:$0x1]  ;;  %s816_s19 = smov (!%p488_p7, %s814_s19), 63  ;;  %p493_p9 = scmp.lt.s32.totalorder %s744_s21, 63 }
  0x6c   : > { %487 = vst [vmem:[%s693_s20 + $0x6] sm:$0x1] %v195_v13  ;;  %s207_s1 = scalar_select %p206_p8, %s744_s21, 0 }
  0x6d   : > { %s210_s24 = scalar_lea.vmem [#allocation7], %s816_s19  ;;  %56 = sbr.rel (!%p54_p10) target bundleno = 53 (0x35), region = 75 }
  0x6e   : > { %v211_v14 = vld [vmem:[%s210_s24] sm:$0x1]  ;;  %s818_s1 = smov (!%p493_p9, %s207_s1), 63 }
  0x6f   : > { %499 = vst [vmem:[%s689_s18 + $0x7] sm:$0x1] %v211_v14  ;;  %s214_s25 = scalar_lea.vmem [#allocation9], %s818_s1 }
  0x70   : > { %v215_v15 = vld [vmem:[%s214_s25] sm:$0x1] }
  0x71   : > { %501 = vst [vmem:[%s693_s20 + $0x7] sm:$0x1] %v215_v15 }
  0x76   :  { %v218_v16 = vld [vmem:[#allocation2] sm:$0xff]  ;;  %v219_v18 = vld [vmem:[#allocation2 + $0x8] sm:$0xff]  ;;  %v220_v22 = vld [vmem:[#allocation2 + $0x10] sm:$0xff] }
  0x77   :  { %v221_v25 = vld [vmem:[#allocation2 + $0x18] sm:$0xff]  ;;  %v222_v28 = vld [vmem:[#allocation2 + $0x20] sm:$0xff]  ;;  %v223_v31 = vld [vmem:[#allocation2 + $0x28] sm:$0xff] }
  0x78   :  { %v234_v17 = vld [vmem:[#allocation3] sm:$0xff]  ;;  %v235_v20 = vld [vmem:[#allocation3 + $0x8] sm:$0xff]  ;;  %v236_v23 = vld [vmem:[#allocation3 + $0x10] sm:$0xff] }
  0x79   :  { %v250_v19 = vmul.f32 %v234_v17, %v218_v16  ;;  %v251_v21 = vmul.f32 %v235_v20, %v219_v18  ;;  %v252_v24 = vmul.f32 %v236_v23, %v220_v22  ;;  %v237_v26 = vld [vmem:[#allocation3 + $0x18] sm:$0xff]  ;;  %v238_v29 = vld [vmem:[#allocation3 + $0x20] sm:$0xff]  ;;  %v239_v32 = vld [vmem:[#allocation3 + $0x28] sm:$0xff] }
  0x7a   :  { %v253_v27 = vmul.f32 %v237_v26, %v221_v25  ;;  %v254_v30 = vmul.f32 %v238_v29, %v222_v28  ;;  %v255_v33 = vmul.f32 %v239_v32, %v223_v31  ;;  %v224_v34 = vld [vmem:[#allocation2 + $0x30] sm:$0xff]  ;;  %v225_v37 = vld [vmem:[#allocation2 + $0x38] sm:$0xff]  ;;  %v226_v40 = vld [vmem:[#allocation2 + $0x40] sm:$0xff] }
  0x7b   :  { %266 = vxpose.xlu0.b32.start [1/16] %v250_v19, 128  ;;  %v240_v35 = vld [vmem:[#allocation3 + $0x30] sm:$0xff]  ;;  %v241_v38 = vld [vmem:[#allocation3 + $0x38] sm:$0xff]  ;;  %v242_v41 = vld [vmem:[#allocation3 + $0x40] sm:$0xff] }
  0x7c   :  { %v256_v36 = vmul.f32 %v240_v35, %v224_v34  ;;  %v257_v39 = vmul.f32 %v241_v38, %v225_v37  ;;  %v258_v42 = vmul.f32 %v242_v41, %v226_v40  ;;  %v227_v43 = vld [vmem:[#allocation2 + $0x48] sm:$0xff]  ;;  %v228_v46 = vld [vmem:[#allocation2 + $0x50] sm:$0xff]  ;;  %v229_v49 = vld [vmem:[#allocation2 + $0x58] sm:$0xff] }
  0x7d   :  { %v243_v44 = vld [vmem:[#allocation3 + $0x48] sm:$0xff]  ;;  %v244_v47 = vld [vmem:[#allocation3 + $0x50] sm:$0xff]  ;;  %v245_v50 = vld [vmem:[#allocation3 + $0x58] sm:$0xff] }
  0x7e   :  { %v259_v45 = vmul.f32 %v243_v44, %v227_v43  ;;  %v260_v48 = vmul.f32 %v244_v47, %v228_v46  ;;  %v261_v51 = vmul.f32 %v245_v50, %v229_v49  ;;  %v230_v52 = vld [vmem:[#allocation2 + $0x60] sm:$0xff]  ;;  %v231_v55 = vld [vmem:[#allocation2 + $0x68] sm:$0xff]  ;;  %v232_v58 = vld [vmem:[#allocation2 + $0x70] sm:$0xff] }
  0x7f   :  { %267 = vxpose.xlu0.b32.cont [2/16] %v251_v21, 128  ;;  %v246_v53 = vld [vmem:[#allocation3 + $0x60] sm:$0xff]  ;;  %v247_v56 = vld [vmem:[#allocation3 + $0x68] sm:$0xff]  ;;  %v248_v59 = vld [vmem:[#allocation3 + $0x70] sm:$0xff] }
  0x80   :  { %v262_v54 = vmul.f32 %v246_v53, %v230_v52  ;;  %v263_v57 = vmul.f32 %v247_v56, %v231_v55  ;;  %v264_v60 = vmul.f32 %v248_v59, %v232_v58  ;;  %v233_v61 = vld [vmem:[#allocation2 + $0x78] sm:$0xff] }
  0x81   :  { %v249_v62 = vld [vmem:[#allocation3 + $0x78] sm:$0xff] }
  0x82   :  { %v265_v63 = vmul.f32 %v249_v62, %v233_v61 }
  0x83   :  { %268 = vxpose.xlu0.b32.cont [3/16] %v252_v24, 128 }
  0x87   :  { %269 = vxpose.xlu0.b32.cont [4/16] %v253_v27, 128 }
  0x8b   :  { %270 = vxpose.xlu0.b32.cont [5/16] %v254_v30, 128 }
  0x8f   :  { %271 = vxpose.xlu0.b32.cont [6/16] %v255_v33, 128 }
  0x93   :  { %272 = vxpose.xlu0.b32.cont [7/16] %v256_v36, 128 }
  0x97   :  { %273 = vxpose.xlu0.b32.cont [8/16] %v257_v39, 128 }
  0x9b   :  { %274 = vxpose.xlu0.b32.cont [9/16] %v258_v42, 128 }
  0x9f   :  { %275 = vxpose.xlu0.b32.cont [10/16] %v259_v45, 128 }
  0xa3   :  { %276 = vxpose.xlu0.b32.cont [11/16] %v260_v48, 128 }
  0xa7   :  { %277 = vxpose.xlu0.b32.cont [12/16] %v261_v51, 128 }
  0xab   :  { %278 = vxpose.xlu0.b32.cont [13/16] %v262_v54, 128 }
  0xaf   :  { %279 = vxpose.xlu0.b32.cont [14/16] %v263_v57, 128 }
  0xb3   :  { %280 = vxpose.xlu0.b32.cont [15/16] %v264_v60, 128 }
  0xb7   :  { %281 = vxpose.xlu0.b32.end [16/16] %v265_v63, 128 }
  0xf7   :  { %v282_v0 = vpop.trf.xlu0 }
  0xfb   :  { %v283_v1 = vpop.trf.xlu0 }
  0xfc   :  { %v298_v9 = vadd.f32 %v283_v1, %v282_v0 }
  0xff   :  { %v284_v2 = vpop.trf.xlu0 }
 0x100   :  { %v299_v10 = vadd.f32 %v298_v9, %v284_v2 }
 0x103   :  { %v285_v3 = vpop.trf.xlu0 }
 0x104   :  { %v300_v12 = vadd.f32 %v299_v10, %v285_v3 }
 0x107   :  { %v286_v4 = vpop.trf.xlu0 }
 0x108   :  { %v301_v13 = vadd.f32 %v300_v12, %v286_v4 }
 0x10b   :  { %v287_v5 = vpop.trf.xlu0 }
 0x10c   :  { %v302_v15 = vadd.f32 %v301_v13, %v287_v5 }
 0x10f   :  { %v288_v6 = vpop.trf.xlu0 }
 0x110   :  { %v303_v16 = vadd.f32 %v302_v15, %v288_v6 }
 0x113   :  { %v289_v7 = vpop.trf.xlu0 }
 0x114   :  { %v304_v18 = vadd.f32 %v303_v16, %v289_v7 }
 0x117   :  { %v290_v8 = vpop.trf.xlu0 }
 0x118   :  { %v305_v19 = vadd.f32 %v304_v18, %v290_v8 }
 0x11b   :  { %v291_v11 = vpop.trf.xlu0 }
 0x11c   :  { %v306_v21 = vadd.f32 %v305_v19, %v291_v11 }
 0x11f   :  { %v292_v14 = vpop.trf.xlu0 }
 0x120   :  { %v307_v22 = vadd.f32 %v306_v21, %v292_v14 }
 0x123   :  { %v293_v17 = vpop.trf.xlu0 }
 0x124   :  { %v308_v24 = vadd.f32 %v307_v22, %v293_v17 }
 0x127   :  { %v294_v20 = vpop.trf.xlu0 }
 0x128   :  { %v309_v25 = vadd.f32 %v308_v24, %v294_v20 }
 0x12b   :  { %v295_v23 = vpop.trf.xlu0 }
 0x12c   :  { %v310_v27 = vadd.f32 %v309_v25, %v295_v23 }
 0x12f   :  { %v296_v26 = vpop.trf.xlu0 }
 0x130   :  { %v311_v28 = vadd.f32 %v310_v27, %v296_v26 }
 0x133   :  { %v297_v29 = vpop.trf.xlu0 }
 0x134   :  { %v312_v30 = vadd.f32 %v311_v28, %v297_v29 }
 0x136   :  { %v313_v31 = vrot.slane %v312_v30, 4 }
 0x138   :  { %v314_v32 = vadd.f32 %v313_v31, %v312_v30 }
 0x13a   :  { %v315_v33 = vrot.slane %v314_v32, 2 }
 0x13c   :  { %v316_v34 = vadd.f32 %v315_v33, %v314_v32 }
 0x13e   :  { %v317_v35 = vrot.slane %v316_v34, 1 }
 0x140   :  { %v318_v36 = vadd.f32 %v317_v35, %v316_v34 }
 0x142   :  { %319 = vst [vmem:[%s763_s4] sm:$0x1] %v318_v36 }
 0x143   :  { %324 = vsyncpa [#allocation8], 1 }
 0x144   :  { %325 = vsyncpa [#allocation10], 1 }

</bundles_post_ra>
